<compile_context>
chip_gen: v6e
topology: v6e:2x2x1
jax: 0.10.0
libtpu: 0.0.40
codegen_flags: <defaults>
</compile_context>

<pallas_src>
import numpy as np
import jax
import jax.numpy as jnp
from jax.experimental import pallas as pl
from jax.experimental.pallas import tpu as pltpu


# --------------------------------------------------------------------------
# Kernel: per-tile NIN projection.
#   x_ref : (C, TM)   activations — channels on sublanes, flat spatial on lanes
#   w_ref : (C, N)    NIN weight (in_dim, num_units), resident across grid
#   b_ref : (N, 1)    bias
#   o_ref : (N, TM)   output — out-channels on sublanes, flat spatial on lanes
# --------------------------------------------------------------------------
def _nin_kernel(x_ref, w_ref, b_ref, o_ref):
    # out[n, m] = sum_c w[c, n] * x[c, m]   (single MXU matmul, K = C)
    y = jax.lax.dot_general(
        w_ref[...], x_ref[...],
        dimension_numbers=(((0,), (0,)), ((), ())),
        preferred_element_type=jnp.float32)            # (N, TM)
    o_ref[...] = (y + b_ref[...]).astype(o_ref.dtype)  # bias broadcast over lanes


def _pick_m_tile(hw, cap=1024):
    """Largest multiple of 128 that divides hw (capped), else the full extent."""
    if hw <= 128 or hw % 128 != 0:
        return hw
    tm = 128
    for cand in range(128, min(hw, cap) + 1, 128):
        if hw % cand == 0:
            tm = cand
    return tm


# --------------------------------------------------------------------------
# Module wrapper
# --------------------------------------------------------------------------
class NINPallas:
    """Pallas port of models.NIN (per-pixel channel projection)."""

    def __init__(self, in_dim, num_units, init_scale=0.1, key=None):
        self.in_dim = in_dim
        self.num_units = num_units
        if key is None:
            key = jax.random.PRNGKey(42)
        # default_init(scale=init_scale): variance_scaling(scale,'fan_avg','uniform')
        # for shape (in_dim, num_units) with in_axis=1, out_axis=0:
        #   receptive_field_size = 1, fan_in = num_units, fan_out = in_dim
        scale = 1e-10 if init_scale == 0 else init_scale
        denom = (num_units + in_dim) / 2.0
        bound = float(np.sqrt(3.0 * scale / denom))
        self.W = jax.random.uniform(
            key, (in_dim, num_units), jnp.float32, -bound, bound)
        self.b = jnp.zeros((num_units,), jnp.float32)

    def __call__(self, x_nchw):
        B, C, H, W = x_nchw.shape
        assert C == self.in_dim
        N = self.num_units
        HW = H * W

        # Free contiguous reshape: NCHW -> (B, C, H*W).  No transpose needed;
        # the kernel contracts C directly and writes the NCHW result layout.
        x2 = x_nchw.reshape(B, C, HW)
        b2 = self.b.reshape(N, 1)

        TM = _pick_m_tile(HW)
        n_m = HW // TM

        out = pl.pallas_call(
            _nin_kernel,
            out_shape=jax.ShapeDtypeStruct((B, N, HW), x_nchw.dtype),
            grid=(B, n_m),
            in_specs=[
                pl.BlockSpec((pl.Squeezed(), C, TM), lambda b, m: (b, 0, m)),
                pl.BlockSpec((C, N), lambda b, m: (0, 0)),   # VMEM-resident weight
                pl.BlockSpec((N, 1), lambda b, m: (0, 0)),   # VMEM-resident bias
            ],
            out_specs=pl.BlockSpec((pl.Squeezed(), N, TM), lambda b, m: (b, 0, m)),
            compiler_params=pltpu.CompilerParams(
                dimension_semantics=("parallel", "parallel"),
                vmem_limit_bytes=32 * 1024 * 1024),
        )(x2, self.W, b2)

        return out.reshape(B, N, H, W)


# --------------------------------------------------------------------------
# Pure-JAX reference (mirrors permute + contract_inner + bias + permute)
# --------------------------------------------------------------------------
def _reference(x_nchw, module: NINPallas):
    x = jnp.transpose(x_nchw, (0, 2, 3, 1))                    # NCHW -> NHWC
    y = jnp.einsum('bhwc,cn->bhwn', x, module.W) + module.b    # tensordot(x,W,1)+b
    return jnp.transpose(y, (0, 3, 1, 2))                      # NHWC -> NCHW


if __name__ == "__main__":
    key = jax.random.PRNGKey(0)
    B, C, H, W = 2, 4, 16, 16
    num_units = 8
    x = jax.random.normal(key, (B, C, H, W), dtype=jnp.float32)

    nin = NINPallas(C, num_units, init_scale=0.1, key=jax.random.PRNGKey(1))
    y = jax.block_until_ready(nin(x))
    assert y.shape == (B, num_units, H, W)

    y_ref = jax.block_until_ready(_reference(x, nin))
    np.testing.assert_allclose(np.asarray(y), np.asarray(y_ref),
                               rtol=1e-2, atol=1e-2)

    print("KERNEL_OK")
</pallas_src>

<mosaic_0001>
module attributes {stable_mosaic.version = 11 : i64} {
  func.func @_nin_kernel(%arg0: i32, %arg1: i32, %arg2: memref<1x4x256xf32, #tpu.memory_space<vmem>>, %arg3: memref<4x8xf32, #tpu.memory_space<vmem>>, %arg4: memref<8x1xf32, #tpu.memory_space<vmem>>, %arg5: memref<1x8x256xf32, #tpu.memory_space<vmem>>) attributes {dimension_semantics = [#tpu.dimension_semantics<parallel>, #tpu.dimension_semantics<parallel>], iteration_bounds = array<i64: 2, 1>, scalar_prefetch = 0 : i64, scratch_operands = 0 : i64, tpu.core_type = #tpu.core_type<tc>, window_params = [{transform_indices = @transform_0, window_bounds = array<i64: 1, 4, 256>}, {pipeline_mode = #tpu.pipeline_mode<synchronous>, transform_indices = @transform_1, window_bounds = array<i64: 4, 8>}, {pipeline_mode = #tpu.pipeline_mode<synchronous>, transform_indices = @transform_2, window_bounds = array<i64: 8, 1>}, {transform_indices = @transform_3, window_bounds = array<i64: 1, 8, 256>}]} {
    %c0 = arith.constant 0 : index
    %c0_0 = arith.constant 0 : index
    %0 = vector.load %arg3[%c0, %c0_0] : memref<4x8xf32, #tpu.memory_space<vmem>>, vector<4x8xf32>
    %c0_1 = arith.constant 0 : index
    %c0_2 = arith.constant 0 : index
    %c0_3 = arith.constant 0 : index
    %1 = vector.load %arg2[%c0_1, %c0_2, %c0_3] : memref<1x4x256xf32, #tpu.memory_space<vmem>>, vector<1x4x256xf32>
    %2 = vector.shape_cast %1 : vector<1x4x256xf32> to vector<4x256xf32>
    %cst = arith.constant dense<0.000000e+00> : vector<8x256xf32>
    %3 = tpu.matmul %0, %2, %cst {dimension_numbers = #tpu.dot_dimension_numbers<[0], [0], [1], [1], [0, 1, 1, 1], [], []>} : vector<4x8xf32>, vector<4x256xf32>, vector<8x256xf32> -> vector<8x256xf32>
    %c0_4 = arith.constant 0 : index
    %c0_5 = arith.constant 0 : index
    %4 = vector.load %arg4[%c0_4, %c0_5] : memref<8x1xf32, #tpu.memory_space<vmem>>, vector<8x1xf32>
    %5 = vector.broadcast %4 : vector<8x1xf32> to vector<8x256xf32>
    %6 = arith.addf %3, %5 : vector<8x256xf32>
    %c0_6 = arith.constant 0 : index
    %c0_7 = arith.constant 0 : index
    %c0_8 = arith.constant 0 : index
    %7 = vector.load %arg5[%c0_6, %c0_7, %c0_8] : memref<1x8x256xf32, #tpu.memory_space<vmem>>, vector<1x8x256xf32>
    %8 = vector.shape_cast %7 : vector<1x8x256xf32> to vector<8x256xf32>
    %9 = vector.shape_cast %6 : vector<8x256xf32> to vector<1x8x256xf32>
    tpu.vector_store %arg5[%c0_6, %c0_7, %c0_8], %9 {strides = array<i32>} : memref<1x8x256xf32, #tpu.memory_space<vmem>>, vector<1x8x256xf32>,
    return
  }
  func.func @transform_0(%arg0: i32, %arg1: i32) -> (i32, i32, i32) {
    %c0_i32 = arith.constant 0 : i32
    %c0_i32_0 = arith.constant 0 : i32
    return %arg0, %c0_i32, %arg1 : i32, i32, i32
  }
  func.func @transform_1(%arg0: i32, %arg1: i32) -> (i32, i32) {
    %c0_i32 = arith.constant 0 : i32
    %c0_i32_0 = arith.constant 0 : i32
    %c0_i32_1 = arith.constant 0 : i32
    return %c0_i32, %c0_i32_0 : i32, i32
  }
  func.func @transform_2(%arg0: i32, %arg1: i32) -> (i32, i32) {
    %c0_i32 = arith.constant 0 : i32
    %c0_i32_0 = arith.constant 0 : i32
    %c0_i32_1 = arith.constant 0 : i32
    return %c0_i32, %c0_i32_0 : i32, i32
  }
  func.func @transform_3(%arg0: i32, %arg1: i32) -> (i32, i32, i32) {
    %c0_i32 = arith.constant 0 : i32
    %c0_i32_0 = arith.constant 0 : i32
    return %arg0, %c0_i32, %arg1 : i32, i32, i32
  }
}

</mosaic_0001>

<bundles_post_ra>
// kernel: tpu_custom_call.1
= control target key start
LH: loop header
LB: loop body
LE: loop exit
PB: predicated region body
PF: predicated region fallthrough
CT: control target
= control target key end

     0   :  { %8 = vsyncpa [#allocation3], 0  ;;  %s793_s0 = inlined_call_operand.hbm [shape: f32[2,4,256], index: 0, kind: input, shape index: {}]   ;;  %s794_s1 = inlined_call_operand.vmem [shape: f32[4,8], index: 1, kind: input, shape index: {}]   ;;  %s795_s2 = inlined_call_operand.vmem [shape: f32[8,1], index: 2, kind: input, shape index: {}]   ;;  %s796_s3 = inlined_call_operand.hbm [shape: f32[2,8,256], index: 3, kind: output, shape index: {}]  }
   0x1   :  { %10 = vsyncpa [#allocation3 + $0x1], 0 }
   0x2   :  { %11 = vsyncpa [#allocation4], 0 }
   0x3   :  { %13 = vsyncpa [#allocation4 + $0x1], 0  ;;  %s652_s12 = smov 0   ;;  %s654_s13 = smov 0  }
   0x4   :  { %s656_s14 = smov 0   ;;  %s658_s15 = smov 0  }
   0x5   :  { %s660_s16 = smov 0   ;;  %s662_s17 = smov 0  }
   0x6 LB: > { %s432_s18 = sadd.s32 4294967295, %s626_s17   ;;  %s433_s19 = sadd.s32 4294967294, %s626_s17   ;;  %s626_s17 = sphi %s662_s17, %s19_s17   ;;  %s622_s16 = sphi %s660_s16, %s808_s16   ;;  %s618_s15 = sphi %s658_s15, %s807_s15   ;;  %s614_s14 = sphi %s656_s14, %s806_s14   ;;  %s610_s13 = sphi %s654_s13, %s805_s13   ;;  %s606_s12 = sphi %s652_s12, %s804_s12  }
   0x7   : > { %s31_s20 = sadd.s32 1, %s622_s16  ;;  %s40_s21 = sadd.s32 1, %s614_s14 }
   0x8   : > { %p33_p0 = scmp.ge.s32.totalorder %s31_s20, 2  ;;  %p47_p1 = scmp.ne.s32.totalorder %s614_s14, %s610_s13 }
   0x9   : > { %p48_p2 = scmp.eq.s32.totalorder %s626_s17, 0  ;;  %p53_p3 = scmp.ne.s32.totalorder %s610_s13, %s606_s12 }
   0xa   : > { %s810_s20 = smov (%p33_p0, %s31_s20), 0  ;;  %p54_p5 = scmp.eq.s32.totalorder %s432_s18, 0 }
   0xb   : > { %p693_p4 = por %p48_p2, %p47_p1  ;;  %s35_s23 = ssub.s32 %s622_s16, %s810_s20 }
   0xc   : > { %p121_p6 = scmp.eq.s32.totalorder %s432_s18, 1  ;;  %p38_p7 = scmp.eq.s32.totalorder %s35_s23, 0 }
   0xd   : > { %p699_p8 = por %p54_p5, %p53_p3  ;;  %p127_p10 = scmp.eq.s32.totalorder %s433_s19, 1 }
   0xe   : > { %p703_p9 = por %p121_p6, %p47_p1  ;;  %p464_p13 = scmp.lt.s32.totalorder %s626_s17, 2 }
   0xf   : > { %s708_s26 = scalar_select %p38_p7, %s614_s14, %s40_s21  }
  0x10   : > { %p710_p11 = por %p127_p10, %p53_p3  ;;  %s153_s28 = sand.u32 1, %s614_s14  }
  0x11   : > { %s436_s29 = sshll.u32 %s153_s28, 3  ;;  %s450_s30 = sshll.u32 %s622_s16, 7 }
  0x12   : > { %s800_s27 = scalar_select %p710_p11, 1, 0 }
  0x13   : > { %s165_s6 = scalar_lea.hbm %s793_s0, %s450_s30  ;;  %s157_s7 = scalar_lea.vmem [#allocation2], %s436_s29 }
  0x14   : > { %s167_s8 = sshll.u32 %s157_s7, 4  ;;  %p723_p0 = pnand %p464_p13, %p693_p4  ;;  %s168_s8 = int_to_ptr.vmem [resolvable:$true] %s167_s8 }
  0x15   : > { %p439_p1 = scmp.ge.s32.totalorder %s626_s17, 1  ;;  %p172_p2 = scmp.lt.s32.totalorder %s626_s17, 3 }
  0x16   : > { %s154_s10 = scalar_lea.sflag [#allocation3], %s153_s28  ;;  %p520_p3 = pneg %p723_p0 }
  0x17   : > { %s531_s11 = scalar_lea.vmem %s168_s8, 128  ;;  %s628_s18 = smov [#allocation2]  }
  0x18   : > { %p532_p5 = scmp.ne.s32.totalorder %s168_s8, %s531_s11  ;;  %s536_s19 = sshll.u32 %s628_s18, 4  ;;  %s537_s19 = int_to_ptr.vmem [resolvable:$false] %s536_s19 }
  0x19   : > { %s538_s21 = scalar_lea.vmem %s537_s19, 256  ;;  %p539_p10 = scmp.lt.s32.totalorder %s168_s8, %s537_s19 }
  0x1a   : > { %p534_p6 = pnand %p532_p5, %p520_p3  ;;  %p540_p12 = scmp.lt.s32.totalorder %s538_s21, %s531_s11 }
  0x1c   : > { %p535_p7 = pneg %p534_p6  ;;  %p541_p4 = por %p540_p12, %p539_p10 }
  0x1e   : > { %p542_p13 = pnand %p541_p4, %p535_p7 }
  0x20   : > { %545 = shalt.err (!%p542_p13)
}
  0x21   : > { %459 = dma.hbm_to_vmem [thread:$0]  (!%p723_p0), %s165_s6, 128, %s168_s8, %s154_s10  }
  0x22   : > { %p173_p11 = pnand %p439_p1, %p172_p2 }
  0x23   : > { %s738_s22 = sand.u32 (!%p173_p11), 1, %s610_s13  }
  0x24   : > { %176 = sbr.rel (%p173_p11) target bundleno = 378 (0x17a), region = 32  ;;  %s440_s23 = sshll.u32 (!%p173_p11), %s738_s22, 3 }
  0x25   : > { %s179_s28 = scalar_lea.sflag (!%p173_p11), [#allocation3], %s738_s22  ;;  %s182_s29 = scalar_lea.vmem (!%p173_p11), [#allocation2], %s440_s23 }
  0x29   : > { %597 = dma.done.wait (%p699_p8), %s179_s28, 128  }
  0x2a   : > { %599 = vsyncadd (%p699_p8), %s179_s28, 4294967168  ;;  %v629_v0 = vmov 0.0   ;;  %v207_v1 = vld [vmem:[%s794_s1] sm:$0xf]  ;;  %vm253_vm0 = vcmask 1043456   ;;  %v630_v5 = vmov 0  }
  0x2b   : > { %322 = vmatprep.mubr.f32.mxu0 %v629_v0  ;;  %v208_v2 = vld [vmem:[%s182_s29] sm:$0xff]  ;;  %215 = vxpose.xlu0.b32.start.end [1/1] (short) (narrow) %v207_v1, 8  ;;  %vm249_vm1 = vcmask 31744   ;;  %s441_s24 = sshll.u32 %s738_s22, 4  ;;  %s451_s7 = sshll.u32 %s618_s15, 8 }
  0x2c   : > { %v248_v3 = vcombine.high %v208_v2, %v208_v2  ;;  %v209_v4 = vld [vmem:[%s795_s2] sm:$0xff]  ;;  %s204_s8 = scalar_lea.vmem [#allocation5], %s441_s24  ;;  %s346_s18 = scalar_lea.hbm %s796_s3, %s451_s7 }
  0x2d   : > { %s348_s9 = sshll.u32 %s204_s8, 4  ;;  %s332_s19 = scalar_lea.sflag [#allocation4], %s738_s22  ;;  %s349_s9 = int_to_ptr.vmem [resolvable:$true] %s348_s9 }
  0x2e   : > { %442 = vmatprep.subr.msk.mxu0 %vm253_vm0, %v248_v3  ;;  %s546_s21 = scalar_lea.vmem %s349_s9, 256  ;;  %s631_s23 = smov [#allocation5]  }
  0x2f   : > { %443 = vmatpush1.msk.msra.mxu0 %vm253_vm0, %v208_v2  ;;  %p547_p8 = scmp.ne.s32.totalorder %s349_s9, %s546_s21  ;;  %s550_s15 = sshll.u32 %s631_s23, 4  ;;  %s551_s15 = int_to_ptr.vmem [resolvable:$false] %s550_s15 }
  0x30   : > { %s552_s28 = scalar_lea.vmem %s551_s15, 512  ;;  %p553_p0 = scmp.lt.s32.totalorder %s349_s9, %s551_s15 }
  0x31   : > { %p548_p11 = pnand %p547_p8, %p703_p9  ;;  %p554_p1 = scmp.lt.s32.totalorder %s552_s28, %s546_s21 }
  0x33   : > { %p549_p12 = pneg %p548_p11  ;;  %p555_p2 = por %p554_p1, %p553_p0 }
  0x35   : > { %p556_p3 = pnand %p555_p2, %p549_p12 }
  0x54   : > { %516 = vset.pattern.permute.xlu0 %v630_v5 }
  0x55   : > { %212 = vperm.xlu0 %516, %v209_v4  }
  0xa7   : > { %v231_v6 = vpop.trf.xlu0 }
  0xa8   : > { %444 = vmatmul.mubr.msk.f32.vlgmr.msra.gmra.mxu0 %vm249_vm1, %v231_v6 }
  0xd0   : > { %v213_v7 = vpop.permute.xlu0 %212 }
 0x168   : > { %v324_v8 = vpop.f32.mrf.mxu0 }
 0x169   : > { %v325_v9 = vadd.f32 %v324_v8, %v213_v7 }
 0x16a   : > { %v326_v10 = vpop.f32.mrf.mxu0 }
 0x16b   : > { %329 = vst [vmem:[%s204_s8] sm:$0xff] %v325_v9  ;;  %v327_v11 = vadd.f32 %v326_v10, %v213_v7 }
 0x16d   : > { %330 = vst [vmem:[%s204_s8 + $0x8] sm:$0xff] %v327_v11 }
 0x16e   : > { %559 = shalt.err (!%p556_p3)
}
 0x16f   : > { %s560_s29 = scalar_lea.hbm %s346_s18, 256  ;;  %s564_s4 = scalar_lea.hbm %s796_s3, 512 }
 0x170   : > { %p561_p5 = scmp.ne.s32.totalorder %s346_s18, %s560_s29  ;;  %p565_p10 = scmp.lt.s32.totalorder %s346_s18, %s796_s3 }
 0x171   : > { %p566_p4 = scmp.lt.s32.totalorder %s564_s4, %s560_s29 }
 0x172   : > { %p562_p6 = pnand %p561_p5, %p703_p9 }
 0x173   : > { %p567_p13 = por %p566_p4, %p565_p10 }
 0x174   : > { %p563_p7 = pneg %p562_p6 }
 0x176   : > { %p568_p8 = pnand %p567_p13, %p563_p7 }
 0x178   : > { %571 = shalt.err (!%p568_p8)
}
 0x179   : > { %454 = dma.vmem_to_hbm [thread:$0]  (%p703_p9), %s349_s9, 256, %s346_s18, %s332_s19  }
 0x17a PF: > { %s360_s24 = sand.u32 1, %s606_s12   ;;  %p802_p11 = scmp.ne.s32.totalorder %s800_s27, 0 }
 0x17b   : > { %p803_p12 = scmp.ge.s32.totalorder %s626_s17, 2  ;;  %s361_s7 = scalar_lea.sflag [#allocation4], %s360_s24 }
 0x17d   : > { %p461_p0 = pnand %p803_p12, %p802_p11 }
 0x17f   : > { %p462_p1 = pneg %p461_p0 }
 0x181   : > { %601 = dma.done.wait (%p462_p1), %s361_s7, 256  }
 0x182   : > { %603 = vsyncadd (%p462_p1), %s361_s7, 4294967040  ;;  %s19_s17 = sadd.s32 1, %s626_s17   ;;  %s804_s12 = smov %s610_s13 }
 0x183   : > { %p16_p2 = scmp.ge.s32.totalorder %s19_s17, 4   ;;  %s805_s13 = smov %s614_s14 }
 0x184   : > { %s806_s14 = smov %s708_s26  ;;  %s807_s15 = smov %s622_s16 }
 0x185   : > { %s808_s16 = smov %s810_s20  ;;  %18 = sbr.rel (!%p16_p2) target bundleno = 6 (0x6), region = 77 }
 0x18a   :  { %366 = vsyncpa [#allocation3], 1 }
 0x18b   :  { %368 = vsyncpa [#allocation3 + $0x1], 1 }
 0x18c   :  { %369 = vsyncpa [#allocation4], 1 }
 0x18d   :  { %371 = vsyncpa [#allocation4 + $0x1], 1 }

</bundles_post_ra>
